<compile_context>
chip_gen: v7x
topology: tpu7x:2x2x1
jax: 0.10.0
libtpu: 0.0.40
codegen_flags: <defaults>
</compile_context>

<pallas_src>
import jax
import jax.numpy as jnp
import numpy as np
from jax.experimental import pallas as pl
from jax.experimental.pallas import tpu as pltpu

HIDDEN_SIZE = 16
INPUT_SIZE = 1
OUTPUT_SIZE = 1


def rnn_kernel(x_ref, h0_ref, p_ref, out_ref, hout_ref, hs_ref):
    """Single-layer Elman RNN (tanh) + hoisted Linear head.

    x_ref:    (1, T*B)     inputs, column index t*B + b
    h0_ref:   (H, B)       initial hidden state
    p_ref:    (H+1, H+2)   packed params:
                             [:H, :H]    W_hh
                             [:H, H]     W_ih (column, input_size == 1)
                             [:H, H+1]   b_ih + b_hh
                             [H,  :H]    linear weight (row)
                             [H,  H]     linear bias
    out_ref:  (1, T*B)     per-step linear outputs, column index t*B + b
    hout_ref: (H, B)       final hidden state
    hs_ref:   (H, T*B)     VMEM scratch holding all per-step hidden states
    """
    H, B = h0_ref.shape
    TB = x_ref.shape[1]
    T = TB // B

    whh = p_ref[0:H, 0:H]                    # (H, H)
    wih = p_ref[0:H, H:H + 1]                # (H, 1)
    bias = p_ref[0:H, H + 1:H + 2]           # (H, 1)
    wlin = p_ref[H:H + 1, 0:H]               # (1, H) -- row, MXU-ready
    blin = p_ref[H:H + 1, H:H + 1]           # (1, 1)

    # Parallel pre-work: input + bias contribution for every timestep at once.
    #   pre_all[:, t*B + b] = W_ih * x[t, b] + (b_ih + b_hh)
    pre_all = wih * x_ref[...] + bias        # (H, T*B)

    # Serial recurrence: only dot(W_hh, h) + tanh on the critical path.
    # T is static and small -> fully unrolled, all slices static.
    h = h0_ref[...]                          # (H, B)
    for t in range(T):
        pre_t = pre_all[:, t * B:(t + 1) * B]                        # (H, B)
        h = jnp.tanh(
            jnp.dot(whh, h, preferred_element_type=jnp.float32) + pre_t)
        hs_ref[:, t * B:(t + 1) * B] = h     # cheap VMEM scratch store
    hout_ref[...] = h

    # Hoisted Linear head: one MXU matmul over the stacked hidden states and a
    # single output store (no per-step masked HBM writes, no XLU reduce).
    hs_all = hs_ref[...]                                             # (H, T*B)
    out_ref[...] = (
        jnp.dot(wlin, hs_all, preferred_element_type=jnp.float32) + blin)


def net_forward(x, hidden, params):
    """Mirrors Net.forward: returns (out, hidden).

    x:      (B, T, 1)  float32   (batch_first, input_size = 1)
    hidden: (1, B, H)  float32   (num_layers = 1)
    out:    (1, B*T, 1)
    hidden_out: (1, B, H)
    """
    w_ih, w_hh, b_ih, b_hh, w_lin, b_lin = params
    B, T, _ = x.shape
    H = HIDDEN_SIZE

    # Glue: time-major then flatten to a single lane-dense row (1, T*B),
    # column index t*B + b.
    x_row = jnp.transpose(x[..., 0], (1, 0)).reshape(1, T * B)
    x_row = x_row.astype(jnp.float32)
    h0 = jnp.transpose(hidden[0], (1, 0)).astype(jnp.float32)        # (H, B)

    # Pack all parameters into one (H+1, H+2) block (single small VMEM ref).
    p = jnp.zeros((H + 1, H + 2), jnp.float32)
    p = p.at[:H, :H].set(w_hh.astype(jnp.float32))
    p = p.at[:H, H].set(w_ih[:, 0].astype(jnp.float32))
    p = p.at[:H, H + 1].set((b_ih + b_hh).astype(jnp.float32))
    p = p.at[H, :H].set(w_lin[0, :].astype(jnp.float32))
    p = p.at[H, H].set(b_lin[0].astype(jnp.float32))

    vmem = pl.BlockSpec(memory_space=pltpu.MemorySpace.VMEM)
    out_row, h_final = pl.pallas_call(
        rnn_kernel,
        out_shape=(jax.ShapeDtypeStruct((1, T * B), jnp.float32),
                   jax.ShapeDtypeStruct((H, B), jnp.float32)),
        in_specs=[vmem, vmem, vmem],
        out_specs=(vmem, vmem),
        scratch_shapes=[pltpu.VMEM((H, T * B), jnp.float32)],
    )(x_row, h0, p)

    # Glue back to PyTorch shapes: out.view(-1, H) flattens (B, T, H)
    # row-major -> row index b*T + t, while the kernel's column index is
    # t*B + b, so reshape (T, B), transpose, flatten.
    out = out_row.reshape(T, B).T.reshape(B * T, 1)[None]            # (1,B*T,1)
    hidden_out = h_final.T[None]                                     # (1, B, H)
    return out, hidden_out


def init_params(key):
    """Deterministic parameter init matching nn.RNN / nn.Linear shapes."""
    H, I, O = HIDDEN_SIZE, INPUT_SIZE, OUTPUT_SIZE
    k = 1.0 / np.sqrt(H)
    keys = jax.random.split(key, 6)
    w_ih = jax.random.uniform(keys[0], (H, I), jnp.float32, -k, k)
    w_hh = jax.random.uniform(keys[1], (H, H), jnp.float32, -k, k)
    b_ih = jax.random.uniform(keys[2], (H,), jnp.float32, -k, k)
    b_hh = jax.random.uniform(keys[3], (H,), jnp.float32, -k, k)
    w_lin = jax.random.uniform(keys[4], (O, H), jnp.float32, -k, k)
    b_lin = jax.random.uniform(keys[5], (O,), jnp.float32, -k, k)
    return (w_ih, w_hh, b_ih, b_hh, w_lin, b_lin)


def reference_forward(x, hidden, params):
    """Pure-JAX reference matching the PyTorch semantics (for self-check)."""
    w_ih, w_hh, b_ih, b_hh, w_lin, b_lin = params
    B, T, _ = x.shape
    h = hidden[0]                                                    # (B, H)
    outs = []
    for t in range(T):
        x_t = x[:, t, :]                                             # (B, 1)
        h = jnp.tanh(x_t @ w_ih.T + b_ih + h @ w_hh.T + b_hh)        # (B, H)
        outs.append(h)
    out_seq = jnp.stack(outs, axis=1)                                # (B, T, H)
    out = out_seq.reshape(-1, HIDDEN_SIZE) @ w_lin.T + b_lin         # (B*T, 1)
    return out[None], h[None]


if __name__ == "__main__":
    key = jax.random.PRNGKey(0)
    k_par, k_x, k_h = jax.random.split(key, 3)

    B, T = 2, 8
    params = init_params(k_par)
    x = jax.random.normal(k_x, (B, T, INPUT_SIZE), jnp.float32)
    hidden = jax.random.normal(k_h, (1, B, HIDDEN_SIZE), jnp.float32)

    out, h_out = net_forward(x, hidden, params)
    out = jax.block_until_ready(out)
    h_out = jax.block_until_ready(h_out)

    out_ref, h_ref = reference_forward(x, hidden, params)
    np.testing.assert_allclose(np.asarray(out), np.asarray(out_ref),
                               rtol=1e-5, atol=1e-5)
    np.testing.assert_allclose(np.asarray(h_out), np.asarray(h_ref),
                               rtol=1e-5, atol=1e-5)

    assert out.shape == (1, B * T, OUTPUT_SIZE)
    assert h_out.shape == (1, B, HIDDEN_SIZE)
    print("KERNEL_OK")
</pallas_src>

<mosaic_0001>
module attributes {stable_mosaic.version = 11 : i64} {
  func.func @rnn_kernel(%arg0: memref<1x16xf32, #tpu.memory_space<vmem>>, %arg1: memref<16x2xf32, #tpu.memory_space<vmem>>, %arg2: memref<17x18xf32, #tpu.memory_space<vmem>>, %arg3: memref<1x16xf32, #tpu.memory_space<vmem>>, %arg4: memref<16x2xf32, #tpu.memory_space<vmem>>, %arg5: memref<16x16xf32, #tpu.memory_space<vmem>>) attributes {dimension_semantics = [], scalar_prefetch = 0 : i64, scratch_operands = 1 : i64, tpu.core_type = #tpu.core_type<tc>} {
    %c0 = arith.constant 0 : index
    %c0_0 = arith.constant 0 : index
    %0 = vector.load %arg2[%c0, %c0_0] : memref<17x18xf32, #tpu.memory_space<vmem>>, vector<16x16xf32>
    %c0_1 = arith.constant 0 : index
    %c16 = arith.constant 16 : index
    %1 = vector.load %arg2[%c0_1, %c16] : memref<17x18xf32, #tpu.memory_space<vmem>>, vector<16x1xf32>
    %c0_2 = arith.constant 0 : index
    %c17 = arith.constant 17 : index
    %2 = vector.load %arg2[%c0_2, %c17] : memref<17x18xf32, #tpu.memory_space<vmem>>, vector<16x1xf32>
    %c16_3 = arith.constant 16 : index
    %c0_4 = arith.constant 0 : index
    %3 = vector.load %arg2[%c16_3, %c0_4] : memref<17x18xf32, #tpu.memory_space<vmem>>, vector<1x16xf32>
    %c16_5 = arith.constant 16 : index
    %c16_6 = arith.constant 16 : index
    %4 = vector.load %arg2[%c16_5, %c16_6] : memref<17x18xf32, #tpu.memory_space<vmem>>, vector<1x1xf32>
    %c0_7 = arith.constant 0 : index
    %c0_8 = arith.constant 0 : index
    %5 = vector.load %arg0[%c0_7, %c0_8] : memref<1x16xf32, #tpu.memory_space<vmem>>, vector<1x16xf32>
    %6 = vector.broadcast %1 : vector<16x1xf32> to vector<16x16xf32>
    %7 = vector.broadcast %5 : vector<1x16xf32> to vector<16x16xf32>
    %8 = arith.mulf %6, %7 : vector<16x16xf32>
    %9 = vector.broadcast %2 : vector<16x1xf32> to vector<16x16xf32>
    %10 = arith.addf %8, %9 : vector<16x16xf32>
    %c0_9 = arith.constant 0 : index
    %c0_10 = arith.constant 0 : index
    %11 = vector.load %arg1[%c0_9, %c0_10] : memref<16x2xf32, #tpu.memory_space<vmem>>, vector<16x2xf32>
    %12 = vector.extract_strided_slice %10 {offsets = [0, 0], sizes = [16, 2], strides = [1, 1]} : vector<16x16xf32> to vector<16x2xf32>
    %cst = arith.constant dense<0.000000e+00> : vector<16x2xf32>
    %13 = tpu.matmul %0, %11, %cst {dimension_numbers = #tpu.dot_dimension_numbers<[1], [0], [0], [1], [0, 0, 1, 1], [], []>} : vector<16x16xf32>, vector<16x2xf32>, vector<16x2xf32> -> vector<16x2xf32>
    %14 = arith.addf %13, %12 : vector<16x2xf32>
    %15 = math.tanh %14 : vector<16x2xf32>
    %c0_11 = arith.constant 0 : index
    %c0_12 = arith.constant 0 : index
    %16 = vector.load %arg5[%c0_11, %c0_12] : memref<16x16xf32, #tpu.memory_space<vmem>>, vector<16x2xf32>
    tpu.vector_store %arg5[%c0_11, %c0_12], %15 {strides = array<i32>} : memref<16x16xf32, #tpu.memory_space<vmem>>, vector<16x2xf32>,
    %17 = vector.extract_strided_slice %10 {offsets = [0, 2], sizes = [16, 2], strides = [1, 1]} : vector<16x16xf32> to vector<16x2xf32>
    %cst_13 = arith.constant dense<0.000000e+00> : vector<16x2xf32>
    %18 = tpu.matmul %0, %15, %cst_13 {dimension_numbers = #tpu.dot_dimension_numbers<[1], [0], [0], [1], [0, 0, 1, 1], [], []>} : vector<16x16xf32>, vector<16x2xf32>, vector<16x2xf32> -> vector<16x2xf32>
    %19 = arith.addf %18, %17 : vector<16x2xf32>
    %20 = math.tanh %19 : vector<16x2xf32>
    %c0_14 = arith.constant 0 : index
    %c2 = arith.constant 2 : index
    %21 = vector.load %arg5[%c0_14, %c2] : memref<16x16xf32, #tpu.memory_space<vmem>>, vector<16x2xf32>
    tpu.vector_store %arg5[%c0_14, %c2], %20 {strides = array<i32>} : memref<16x16xf32, #tpu.memory_space<vmem>>, vector<16x2xf32>,
    %22 = vector.extract_strided_slice %10 {offsets = [0, 4], sizes = [16, 2], strides = [1, 1]} : vector<16x16xf32> to vector<16x2xf32>
    %cst_15 = arith.constant dense<0.000000e+00> : vector<16x2xf32>
    %23 = tpu.matmul %0, %20, %cst_15 {dimension_numbers = #tpu.dot_dimension_numbers<[1], [0], [0], [1], [0, 0, 1, 1], [], []>} : vector<16x16xf32>, vector<16x2xf32>, vector<16x2xf32> -> vector<16x2xf32>
    %24 = arith.addf %23, %22 : vector<16x2xf32>
    %25 = math.tanh %24 : vector<16x2xf32>
    %c0_16 = arith.constant 0 : index
    %c4 = arith.constant 4 : index
    %26 = vector.load %arg5[%c0_16, %c4] : memref<16x16xf32, #tpu.memory_space<vmem>>, vector<16x2xf32>
    tpu.vector_store %arg5[%c0_16, %c4], %25 {strides = array<i32>} : memref<16x16xf32, #tpu.memory_space<vmem>>, vector<16x2xf32>,
    %27 = vector.extract_strided_slice %10 {offsets = [0, 6], sizes = [16, 2], strides = [1, 1]} : vector<16x16xf32> to vector<16x2xf32>
    %cst_17 = arith.constant dense<0.000000e+00> : vector<16x2xf32>
    %28 = tpu.matmul %0, %25, %cst_17 {dimension_numbers = #tpu.dot_dimension_numbers<[1], [0], [0], [1], [0, 0, 1, 1], [], []>} : vector<16x16xf32>, vector<16x2xf32>, vector<16x2xf32> -> vector<16x2xf32>
    %29 = arith.addf %28, %27 : vector<16x2xf32>
    %30 = math.tanh %29 : vector<16x2xf32>
    %c0_18 = arith.constant 0 : index
    %c6 = arith.constant 6 : index
    %31 = vector.load %arg5[%c0_18, %c6] : memref<16x16xf32, #tpu.memory_space<vmem>>, vector<16x2xf32>
    tpu.vector_store %arg5[%c0_18, %c6], %30 {strides = array<i32>} : memref<16x16xf32, #tpu.memory_space<vmem>>, vector<16x2xf32>,
    %32 = vector.extract_strided_slice %10 {offsets = [0, 8], sizes = [16, 2], strides = [1, 1]} : vector<16x16xf32> to vector<16x2xf32>
    %cst_19 = arith.constant dense<0.000000e+00> : vector<16x2xf32>
    %33 = tpu.matmul %0, %30, %cst_19 {dimension_numbers = #tpu.dot_dimension_numbers<[1], [0], [0], [1], [0, 0, 1, 1], [], []>} : vector<16x16xf32>, vector<16x2xf32>, vector<16x2xf32> -> vector<16x2xf32>
    %34 = arith.addf %33, %32 : vector<16x2xf32>
    %35 = math.tanh %34 : vector<16x2xf32>
    %c0_20 = arith.constant 0 : index
    %c8 = arith.constant 8 : index
    %36 = vector.load %arg5[%c0_20, %c8] : memref<16x16xf32, #tpu.memory_space<vmem>>, vector<16x2xf32>
    tpu.vector_store %arg5[%c0_20, %c8], %35 {strides = array<i32>} : memref<16x16xf32, #tpu.memory_space<vmem>>, vector<16x2xf32>,
    %37 = vector.extract_strided_slice %10 {offsets = [0, 10], sizes = [16, 2], strides = [1, 1]} : vector<16x16xf32> to vector<16x2xf32>
    %cst_21 = arith.constant dense<0.000000e+00> : vector<16x2xf32>
    %38 = tpu.matmul %0, %35, %cst_21 {dimension_numbers = #tpu.dot_dimension_numbers<[1], [0], [0], [1], [0, 0, 1, 1], [], []>} : vector<16x16xf32>, vector<16x2xf32>, vector<16x2xf32> -> vector<16x2xf32>
    %39 = arith.addf %38, %37 : vector<16x2xf32>
    %40 = math.tanh %39 : vector<16x2xf32>
    %c0_22 = arith.constant 0 : index
    %c10 = arith.constant 10 : index
    %41 = vector.load %arg5[%c0_22, %c10] : memref<16x16xf32, #tpu.memory_space<vmem>>, vector<16x2xf32>
    tpu.vector_store %arg5[%c0_22, %c10], %40 {strides = array<i32>} : memref<16x16xf32, #tpu.memory_space<vmem>>, vector<16x2xf32>,
    %42 = vector.extract_strided_slice %10 {offsets = [0, 12], sizes = [16, 2], strides = [1, 1]} : vector<16x16xf32> to vector<16x2xf32>
    %cst_23 = arith.constant dense<0.000000e+00> : vector<16x2xf32>
    %43 = tpu.matmul %0, %40, %cst_23 {dimension_numbers = #tpu.dot_dimension_numbers<[1], [0], [0], [1], [0, 0, 1, 1], [], []>} : vector<16x16xf32>, vector<16x2xf32>, vector<16x2xf32> -> vector<16x2xf32>
    %44 = arith.addf %43, %42 : vector<16x2xf32>
    %45 = math.tanh %44 : vector<16x2xf32>
    %c0_24 = arith.constant 0 : index
    %c12 = arith.constant 12 : index
    %46 = vector.load %arg5[%c0_24, %c12] : memref<16x16xf32, #tpu.memory_space<vmem>>, vector<16x2xf32>
    tpu.vector_store %arg5[%c0_24, %c12], %45 {strides = array<i32>} : memref<16x16xf32, #tpu.memory_space<vmem>>, vector<16x2xf32>,
    %47 = vector.extract_strided_slice %10 {offsets = [0, 14], sizes = [16, 2], strides = [1, 1]} : vector<16x16xf32> to vector<16x2xf32>
    %cst_25 = arith.constant dense<0.000000e+00> : vector<16x2xf32>
    %48 = tpu.matmul %0, %45, %cst_25 {dimension_numbers = #tpu.dot_dimension_numbers<[1], [0], [0], [1], [0, 0, 1, 1], [], []>} : vector<16x16xf32>, vector<16x2xf32>, vector<16x2xf32> -> vector<16x2xf32>
    %49 = arith.addf %48, %47 : vector<16x2xf32>
    %50 = math.tanh %49 : vector<16x2xf32>
    %c0_26 = arith.constant 0 : index
    %c14 = arith.constant 14 : index
    %51 = vector.load %arg5[%c0_26, %c14] : memref<16x16xf32, #tpu.memory_space<vmem>>, vector<16x2xf32>
    tpu.vector_store %arg5[%c0_26, %c14], %50 {strides = array<i32>} : memref<16x16xf32, #tpu.memory_space<vmem>>, vector<16x2xf32>,
    %c0_27 = arith.constant 0 : index
    %c0_28 = arith.constant 0 : index
    %52 = vector.load %arg4[%c0_27, %c0_28] : memref<16x2xf32, #tpu.memory_space<vmem>>, vector<16x2xf32>
    tpu.vector_store %arg4[%c0_27, %c0_28], %50 {strides = array<i32>} : memref<16x2xf32, #tpu.memory_space<vmem>>, vector<16x2xf32>,
    %c0_29 = arith.constant 0 : index
    %c0_30 = arith.constant 0 : index
    %53 = vector.load %arg5[%c0_29, %c0_30] : memref<16x16xf32, #tpu.memory_space<vmem>>, vector<16x16xf32>
    %cst_31 = arith.constant dense<0.000000e+00> : vector<1x16xf32>
    %54 = tpu.matmul %3, %53, %cst_31 {dimension_numbers = #tpu.dot_dimension_numbers<[1], [0], [0], [1], [0, 0, 1, 1], [], []>} : vector<1x16xf32>, vector<16x16xf32>, vector<1x16xf32> -> vector<1x16xf32>
    %55 = vector.broadcast %4 : vector<1x1xf32> to vector<1x16xf32>
    %56 = arith.addf %54, %55 : vector<1x16xf32>
    %c0_32 = arith.constant 0 : index
    %c0_33 = arith.constant 0 : index
    %57 = vector.load %arg3[%c0_32, %c0_33] : memref<1x16xf32, #tpu.memory_space<vmem>>, vector<1x16xf32>
    tpu.vector_store %arg3[%c0_32, %c0_33], %56 {strides = array<i32>} : memref<1x16xf32, #tpu.memory_space<vmem>>, vector<1x16xf32>,
    return
  }
}

</mosaic_0001>

<bundles_post_ra>
// kernel: tpu_custom_call.1
= control target key start
LH: loop header
LB: loop body
LE: loop exit
PB: predicated region body
PF: predicated region fallthrough
CT: control target
= control target key end

     0   :  { %vm51_vm0 = vcmask 130048   ;;  %v1126_v4 = vmov 16   ;;  %s1270_s0 = inlined_call_operand.vmem [shape: f32[1,16], index: 0, kind: input, shape index: {}]   ;;  %s1271_s1 = inlined_call_operand.vmem [shape: f32[16,2], index: 1, kind: input, shape index: {}]   ;;  %s1272_s2 = inlined_call_operand.vmem [shape: f32[17,18], index: 2, kind: input, shape index: {}]   ;;  %s1273_s3 = inlined_call_operand.hbm [shape: f32[1,16], index: 3, kind: output, shape index: {0}]   ;;  %s1274_s4 = inlined_call_operand.vmem [shape: f32[16,2], index: 4, kind: output, shape index: {1}]  }
   0x1   :  { %v49_v0 = vld [vmem:[%s1271_s1] sm:$0xff]  ;;  %v50_v1 = vld [vmem:[%s1271_s1 + $0x8] sm:$0xff]  ;;  %1068 = vset.pattern.permute.xlu0 %v1126_v4 }
   0x2   :  { %v1180_v2 = vld [vmem:[%s1272_s2] sm:$0xff]  ;;  %v1013_v3 = vpack.c.bf16 %v50_v1, %v49_v0 }
   0x3   :  { %954 = vmatprep.mubr.msk.f32.mxu0 %vm51_vm0, %v1180_v2 }
   0x4   :  { %10 = vsyncpa [#allocation4], 0  ;;  %23 = vperm.xlu0 %1068, %v1180_v2   ;;  %v1127_v5 = vmov 17   ;;  %1014 = vmatprep.subr.bf16.mxu0 %v1013_v3  ;;  %v1189_v6 = vld [vmem:[%s1272_s2 + $0x8] sm:$0xff]  ;;  %v897_v7 = vld [vmem:[%s1270_s0] ss:$0 sm:$0xff] }
   0x5   :  { %1069 = vset.pattern.permute.xlu1 %v1127_v5  ;;  %1016 = vmatpush3.bf16.msra.mxu0 %v1013_v3  ;;  %s1128_s24 = smov 126   ;;  %s1129_s25 = smov 124   ;;  %vm133_vm1 = vcmask 15360   ;;  %vm229_vm2 = vcmask 31760   ;;  %vm323_vm3 = vcmask 48160   ;;  %vm417_vm4 = vcmask 64560  }
   0x6   :  { %40 = vperm.xlu1 %1069, %v1180_v2   ;;  %961 = vmatprep.mubr.msk.f32.mxu1 %vm51_vm0, %v1180_v2  ;;  %s1130_s26 = smov 122   ;;  %s1131_s27 = smov 120   ;;  %vm511_vm5 = vcmask 80960   ;;  %vm605_vm6 = vcmask 97360   ;;  %vm699_vm7 = vcmask 113760   ;;  %vm1142_vm8 = vmmov 0  }
   0x7   :  { %s1132_s0 = smov 118   ;;  %s1133_s28 = smov 116   ;;  %vm793_vm9 = vcmask 130160   ;;  %vm877_vm10 = vcmask 122880  }
   0x8   :  { %28 = vperm.xlu0 %1068, %v1189_v6   ;;  %955 = vmatmul.mubr.msk.f32.vlgmr.msra.gmra.mrb[0].mxu0 %vm51_vm0, %v1189_v6  ;;  %s1134_s29 = smov 114   ;;  %s1135_s30 = smov 2  }
   0x9   :  { %968 = vmatprep.mubr.msk.f32.mxu0 %vm51_vm0, %v1180_v2  ;;  %s1136_s5 = smov 4   ;;  %s1137_s6 = smov 6  }
   0xa   :  { %44 = vperm.xlu1 %1069, %v1189_v6   ;;  %s1138_s7 = smov 8   ;;  %s1139_s8 = smov 10  }
   0xb   :  { %s1140_s9 = smov 12   ;;  %s1144_s12 = smov 14  }
   0xc   :  { %s1145_s17 = smov [#allocation3]  }
   0xd   :  { %s885_s18 = sshll.u32 %s1145_s17, 4  ;;  %s886_s18 = int_to_ptr.vmem [resolvable:$true] %s885_s18 }
   0xe   :  { %p1107_p1 = scmp.lt.s32.totalorder %s886_s18, %s886_s18 }
  0x83   :  { %v24_v8 = vpop.permute.xlu0 %23 }
  0x84   :  { %v37_v9 = vmul.f32 %v897_v7, %v24_v8 }
  0x85   :  { %v41_v10 = vpop.permute.xlu1 %40 }
  0x86   :  { %v47_v11 = vadd.f32 %v41_v10, %v37_v9 }
  0x87   :  { %v29_v12 = vpop.permute.xlu0 %28 }
  0x88   :  { %v38_v13 = vmul.f32 %v897_v7, %v29_v12  ;;  %138 = vrot.lane.b32.xlu0 %v47_v11, %s1128_s24 }
  0x89   :  { %v45_v14 = vpop.permute.xlu1 %44 }
  0x8a   :  { %v48_v15 = vadd.f32 %v45_v14, %v38_v13 }
  0x8c   :  { %140 = vrot.lane.b32.xlu1 %v48_v15, %s1128_s24  ;;  %232 = vrot.lane.b32.xlu0 %v47_v11, %s1129_s25 }
  0x90   :  { %234 = vrot.lane.b32.xlu1 %v48_v15, %s1129_s25  ;;  %326 = vrot.lane.b32.xlu0 %v47_v11, %s1130_s26 }
  0x94   :  { %328 = vrot.lane.b32.xlu1 %v48_v15, %s1130_s26  ;;  %420 = vrot.lane.b32.xlu0 %v47_v11, %s1131_s27 }
  0x98   :  { %422 = vrot.lane.b32.xlu1 %v48_v15, %s1131_s27  ;;  %514 = vrot.lane.b32.xlu0 %v47_v11, %s1132_s0 }
  0x9c   :  { %516 = vrot.lane.b32.xlu1 %v48_v15, %s1132_s0  ;;  %608 = vrot.lane.b32.xlu0 %v47_v11, %s1133_s28 }
  0xa0   :  { %610 = vrot.lane.b32.xlu1 %v48_v15, %s1133_s28  ;;  %702 = vrot.lane.b32.xlu0 %v47_v11, %s1134_s29 }
  0xa4   :  { %704 = vrot.lane.b32.xlu1 %v48_v15, %s1134_s29 }
  0xdb   :  { %v956_v16 = vpop.f32.mrb[0].mxu0 }
  0xdc   :  { %v128_v17 = vadd.f32 %v956_v16, %v48_v15  ;;  %v122_v18 = vpop.f32.mrb[1].mxu0 }
  0xdd   :  { %v123_v19 = vadd.f32 %v122_v18, %v47_v11 }
  0xde   :  { %1070 = vtanh.f32 %v128_v17 }
  0xdf   :  { %1072 = vtanh.f32 %v123_v19 }
  0xe8   :  { %v1071_v20 = vpop.eup %1070 }
  0xe9   :  { %v1073_v21 = vpop.eup %1072  ;;  %135 = vst.msk [vmem:[#allocation2 + $0x8] sm:$0xff] %vm133_vm1, %v1071_v20 }
  0xea   :  { %v1017_v22 = vpack.c.bf16 %v1071_v20, %v1073_v21  ;;  %134 = vst.msk [vmem:[#allocation2] sm:$0xff] %vm133_vm1, %v1073_v21 }
  0xec   :  { %1018 = vmatprep.subr.bf16.mxu1 %v1017_v22 }
  0xed   :  { %1020 = vmatpush3.bf16.msra.mxu1 %v1017_v22 }
  0xf0   :  { %962 = vmatmul.mubr.msk.f32.vlgmr.msra.gmra.mrb[0].mxu1 %vm51_vm0, %v1189_v6 }
  0xf1   :  { %975 = vmatprep.mubr.msk.f32.mxu1 %vm51_vm0, %v1180_v2 }
  0xfa   :  { %v139_v25 = vpop.permute.xlu0 %138 }
  0xfe   :  { %v141_v23 = vpop.permute.xlu1 %140  ;;  %v233_v33 = vpop.permute.xlu0 %232 }
 0x102   :  { %v235_v32 = vpop.permute.xlu1 %234  ;;  %v327_v35 = vpop.permute.xlu0 %326 }
 0x106   :  { %v329_v34 = vpop.permute.xlu1 %328  ;;  %v421_v37 = vpop.permute.xlu0 %420 }
 0x10a   :  { %v423_v36 = vpop.permute.xlu1 %422  ;;  %v1214_v39 = vpop.permute.xlu0 %514 }
 0x10e   :  { %v1212_v38 = vpop.permute.xlu1 %516  ;;  %v1218_v41 = vpop.permute.xlu0 %608 }
 0x112   :  { %v1216_v40 = vpop.permute.xlu1 %610  ;;  %v1222_v43 = vpop.permute.xlu0 %702 }
 0x116   :  { %v1220_v42 = vpop.permute.xlu1 %704 }
 0x1c3   :  { %v963_v24 = vpop.f32.mrb[0].mxu1 }
 0x1c4   :  { %v216_v26 = vadd.f32 %v963_v24, %v141_v23  ;;  %v210_v27 = vpop.f32.mrb[1].mxu1 }
 0x1c5   :  { %v211_v28 = vadd.f32 %v210_v27, %v139_v25 }
 0x1c6   :  { %1074 = vtanh.f32 %v216_v26 }
 0x1c7   :  { %1076 = vtanh.f32 %v211_v28 }
 0x1d0   :  { %v1075_v29 = vpop.eup %1074 }
 0x1d1   :  { %v1077_v30 = vpop.eup %1076  ;;  %225 = vrot.lane.b32.xlu1 %v1075_v29, %s1135_s30 }
 0x1d2   :  { %223 = vrot.lane.b32.xlu0 %v1077_v30, %s1135_s30  ;;  %v1021_v31 = vpack.c.bf16 %v1075_v29, %v1077_v30 }
 0x1d4   :  { %1022 = vmatprep.subr.bf16.mxu0 %v1021_v31 }
 0x1d5   :  { %1024 = vmatpush3.bf16.msra.mxu0 %v1021_v31 }
 0x1d8   :  { %969 = vmatmul.mubr.msk.f32.vlgmr.msra.gmra.mrb[2].mxu0 %vm51_vm0, %v1189_v6 }
 0x1d9   :  { %982 = vmatprep.mubr.msk.f32.mxu0 %vm51_vm0, %v1180_v2 }
 0x243   :  { %v226_v44 = vpop.permute.xlu1 %225 }
 0x244   :  { %231 = vst.msk [vmem:[#allocation2 + $0x8] sm:$0xff] %vm229_vm2, %v226_v44  ;;  %v224_v45 = vpop.permute.xlu0 %223 }
 0x245   :  { %230 = vst.msk [vmem:[#allocation2] sm:$0xff] %vm229_vm2, %v224_v45 }
 0x2ab   :  { %v970_v46 = vpop.f32.mrb[2].mxu0 }
 0x2ac   :  { %v310_v47 = vadd.f32 %v970_v46, %v235_v32  ;;  %v304_v48 = vpop.f32.mrb[3].mxu0  ;;  %v1141_v32 = vmov 0.0|0.0  }
 0x2ad   :  { %v305_v49 = vadd.f32 %v304_v48, %v233_v33 }
 0x2ae   :  { %1078 = vtanh.f32 %v310_v47 }
 0x2af   :  { %1080 = vtanh.f32 %v305_v49 }
 0x2b8   :  { %v1079_v50 = vpop.eup %1078 }
 0x2b9   :  { %v1081_v51 = vpop.eup %1080  ;;  %319 = vrot.lane.b32.xlu1 %v1079_v50, %s1136_s5 }
 0x2ba   :  { %317 = vrot.lane.b32.xlu0 %v1081_v51, %s1136_s5  ;;  %v1025_v52 = vpack.c.bf16 %v1079_v50, %v1081_v51 }
 0x2bc   :  { %1026 = vmatprep.subr.bf16.mxu1 %v1025_v52 }
 0x2bd   :  { %1028 = vmatpush3.bf16.msra.mxu1 %v1025_v52 }
 0x2c0   :  { %976 = vmatmul.mubr.msk.f32.vlgmr.msra.gmra.mrb[2].mxu1 %vm51_vm0, %v1189_v6 }
 0x2c1   :  { %989 = vmatprep.mubr.msk.f32.mxu1 %vm51_vm0, %v1180_v2 }
 0x32b   :  { %v320_v53 = vpop.permute.xlu1 %319 }
 0x32c   :  { %325 = vst.msk [vmem:[#allocation2 + $0x8] sm:$0xff] %vm323_vm3, %v320_v53  ;;  %v318_v54 = vpop.permute.xlu0 %317 }
 0x32d   :  { %324 = vst.msk [vmem:[#allocation2] sm:$0xff] %vm323_vm3, %v318_v54 }
 0x393   :  { %v977_v55 = vpop.f32.mrb[2].mxu1 }
 0x394   :  { %v404_v56 = vadd.f32 %v977_v55, %v329_v34  ;;  %v398_v57 = vpop.f32.mrb[3].mxu1  ;;  %v1143_v34 = vmov 0.0  }
 0x395   :  { %v399_v58 = vadd.f32 %v398_v57, %v327_v35  ;;  %v19_v35 = vld [vmem:[%s1272_s2 + $0x10] sm:$0x1]  ;;  %s1102_s2 = scalar_lea.vmem %s886_s18, 16 }
 0x396   :  { %1082 = vtanh.f32 %v404_v56  ;;  %p1103_p0 = scmp.ne.s32.totalorder %s886_s18, %s1102_s2 }
 0x397   :  { %1084 = vtanh.f32 %v399_v58 }
 0x3a0   :  { %v1083_v59 = vpop.eup %1082 }
 0x3a1   :  { %v1085_v60 = vpop.eup %1084  ;;  %413 = vrot.lane.b32.xlu1 %v1083_v59, %s1137_s6 }
 0x3a2   :  { %411 = vrot.lane.b32.xlu0 %v1085_v60, %s1137_s6  ;;  %v1029_v61 = vpack.c.bf16 %v1083_v59, %v1085_v60 }
 0x3a4   :  { %1030 = vmatprep.subr.bf16.mxu0 %v1029_v61 }
 0x3a5   :  { %1032 = vmatpush3.bf16.msra.mxu0 %v1029_v61 }
 0x3a8   :  { %983 = vmatmul.mubr.msk.f32.vlgmr.msra.gmra.mrb[4].mxu0 %vm51_vm0, %v1189_v6 }
 0x3a9   :  { %996 = vmatprep.mubr.msk.f32.mxu0 %vm51_vm0, %v1180_v2 }
 0x413   :  { %v414_v62 = vpop.permute.xlu1 %413 }
 0x414   :  { %419 = vst.msk [vmem:[#allocation2 + $0x8] sm:$0xff] %vm417_vm4, %v414_v62  ;;  %v412_v63 = vpop.permute.xlu0 %411 }
 0x415   :  { %418 = vst.msk [vmem:[#allocation2] sm:$0xff] %vm417_vm4, %v412_v63 }
 0x47b   :  { %v984_v0 = vpop.f32.mrb[4].mxu0 }
 0x47c   :  { %v498_v1 = vadd.f32 %v984_v0, %v423_v36  ;;  %v492_v3 = vpop.f32.mrb[5].mxu0 }
 0x47d   :  { %v493_v4 = vadd.f32 %v492_v3, %v421_v37 }
 0x47e   :  { %1086 = vtanh.f32 %v498_v1 }
 0x47f   :  { %1088 = vtanh.f32 %v493_v4 }
 0x488   :  { %v1087_v5 = vpop.eup %1086 }
 0x489   :  { %v1089_v7 = vpop.eup %1088  ;;  %507 = vrot.lane.b32.xlu1 %v1087_v5, %s1138_s7 }
 0x48a   :  { %505 = vrot.lane.b32.xlu0 %v1089_v7, %s1138_s7  ;;  %v1033_v8 = vpack.c.bf16 %v1087_v5, %v1089_v7 }
 0x48c   :  { %1034 = vmatprep.subr.bf16.mxu1 %v1033_v8 }
 0x48d   :  { %1036 = vmatpush3.bf16.msra.mxu1 %v1033_v8 }
 0x490   :  { %990 = vmatmul.mubr.msk.f32.vlgmr.msra.gmra.mrb[4].mxu1 %vm51_vm0, %v1189_v6 }
 0x491   :  { %1003 = vmatprep.mubr.msk.f32.mxu1 %vm51_vm0, %v1180_v2 }
 0x4fb   :  { %v508_v9 = vpop.permute.xlu1 %507 }
 0x4fc   :  { %513 = vst.msk [vmem:[#allocation2 + $0x8] sm:$0xff] %vm511_vm5, %v508_v9  ;;  %v506_v10 = vpop.permute.xlu0 %505 }
 0x4fd   :  { %512 = vst.msk [vmem:[#allocation2] sm:$0xff] %vm511_vm5, %v506_v10 }
 0x563   :  { %v991_v11 = vpop.f32.mrb[4].mxu1 }
 0x564   :  { %v592_v12 = vadd.f32 %v991_v11, %v1212_v38  ;;  %v586_v13 = vpop.f32.mrb[5].mxu1 }
 0x565   :  { %v587_v14 = vadd.f32 %v586_v13, %v1214_v39 }
 0x566   :  { %1090 = vtanh.f32 %v592_v12 }
 0x567   :  { %1092 = vtanh.f32 %v587_v14 }
 0x570   :  { %v1091_v15 = vpop.eup %1090 }
 0x571   :  { %v1093_v16 = vpop.eup %1092  ;;  %601 = vrot.lane.b32.xlu1 %v1091_v15, %s1139_s8 }
 0x572   :  { %599 = vrot.lane.b32.xlu0 %v1093_v16, %s1139_s8  ;;  %v1037_v17 = vpack.c.bf16 %v1091_v15, %v1093_v16 }
 0x574   :  { %1038 = vmatprep.subr.bf16.mxu0 %v1037_v17 }
 0x575   :  { %1040 = vmatpush3.bf16.msra.mxu0 %v1037_v17 }
 0x576   :  { %1045 = vmatprep.subr.bf16.mxu0 %v1141_v32 }
 0x578   :  { %997 = vmatmul.mubr.msk.f32.vlgmr.msra.gmra.mrb[6].mxu0 %vm51_vm0, %v1189_v6 }
 0x579   :  { %1010 = vmatprep.mubr.msk.f32.mxu0 %vm1142_vm8, %v1143_v34 }
 0x5e3   :  { %v602_v2 = vpop.permute.xlu1 %601 }
 0x5e4   :  { %607 = vst.msk [vmem:[#allocation2 + $0x8] sm:$0xff] %vm605_vm6, %v602_v2  ;;  %v600_v18 = vpop.permute.xlu0 %599 }
 0x5e5   :  { %606 = vst.msk [vmem:[#allocation2] sm:$0xff] %vm605_vm6, %v600_v18 }
 0x64b   :  { %v998_v19 = vpop.f32.mrb[6].mxu0 }
 0x64c   :  { %v686_v20 = vadd.f32 %v998_v19, %v1216_v40  ;;  %v680_v21 = vpop.f32.mrb[7].mxu0 }
 0x64d   :  { %v681_v22 = vadd.f32 %v680_v21, %v1218_v41 }
 0x64e   :  { %1094 = vtanh.f32 %v686_v20 }
 0x64f   :  { %1096 = vtanh.f32 %v681_v22 }
 0x658   :  { %v1095_v23 = vpop.eup %1094 }
 0x659   :  { %v1097_v24 = vpop.eup %1096  ;;  %695 = vrot.lane.b32.xlu1 %v1095_v23, %s1140_s9 }
 0x65a   :  { %693 = vrot.lane.b32.xlu0 %v1097_v24, %s1140_s9  ;;  %v1041_v25 = vpack.c.bf16 %v1095_v23, %v1097_v24 }
 0x65c   :  { %1042 = vmatprep.subr.bf16.mxu1 %v1041_v25 }
 0x65d   :  { %1044 = vmatpush3.bf16.msra.mxu1 %v1041_v25 }
 0x660   :  { %1004 = vmatmul.mubr.msk.f32.vlgmr.msra.gmra.mrb[6].mxu1 %vm51_vm0, %v1189_v6 }
 0x6cb   :  { %v696_v26 = vpop.permute.xlu1 %695 }
 0x6cc   :  { %701 = vst.msk [vmem:[#allocation2 + $0x8] sm:$0xff] %vm699_vm7, %v696_v26  ;;  %v694_v27 = vpop.permute.xlu0 %693 }
 0x6cd   :  { %700 = vst.msk [vmem:[#allocation2] sm:$0xff] %vm699_vm7, %v694_v27 }
 0x733   :  { %v1005_v28 = vpop.f32.mrb[6].mxu1 }
 0x734   :  { %v780_v29 = vadd.f32 %v1005_v28, %v1220_v42  ;;  %v774_v30 = vpop.f32.mrb[7].mxu1 }
 0x735   :  { %v775_v31 = vadd.f32 %v774_v30, %v1222_v43 }
 0x736   :  { %1098 = vtanh.f32 %v780_v29 }
 0x737   :  { %1100 = vtanh.f32 %v775_v31 }
 0x740   :  { %v1099_v33 = vpop.eup %1098 }
 0x741   :  { %v1101_v6 = vpop.eup %1100  ;;  %797 = vst.msk [vmem:[%s1274_s4 + $0x8] sm:$0xff] %vm133_vm1, %v1099_v33  ;;  %789 = vrot.lane.b32.xlu1 %v1099_v33, %s1144_s12 }
 0x742   :  { %796 = vst.msk [vmem:[%s1274_s4] sm:$0xff] %vm133_vm1, %v1101_v6  ;;  %787 = vrot.lane.b32.xlu0 %v1101_v6, %s1144_s12  ;;  %s1106_s4 = scalar_lea.vmem %s886_s18, 32 }
 0x743   :  { %p1108_p2 = scmp.lt.s32.totalorder %s1106_s4, %s1102_s2 }
 0x745   :  { %p1109_p3 = por %p1108_p2, %p1107_p1 }
 0x746   :  { %802 = vperm.xlu0 %1068, %v19_v35  }
 0x747   :  { %p1110_p4 = pnand %p1109_p3, %p1103_p0 }
 0x7b3   :  { %v790_v36 = vpop.permute.xlu1 %789 }
 0x7b4   :  { %795 = vst.msk [vmem:[#allocation2 + $0x8] sm:$0xff] %vm793_vm9, %v790_v36  ;;  %v788_v37 = vpop.permute.xlu0 %787 }
 0x7b5   :  { %794 = vst.msk [vmem:[#allocation2] sm:$0xff] %vm793_vm9, %v788_v37 }
 0x7bb   :  { %v799_v38 = vld [vmem:[#allocation2 + $0x8] sm:$0xff] }
 0x7bc   :  { %v798_v39 = vld [vmem:[#allocation2] sm:$0xff] }
 0x7bd   :  { %v1046_v40 = vpack.c.bf16 %v799_v38, %v798_v39 }
 0x7bf   :  { %1047 = vmatpush3.bf16.msra.mxu0 %v1046_v40 }
 0x7c2   :  { %1011 = vmatmul.mubr.msk.f32.vlgmr.msra.gmra.mrb[8].mxu0 %vm51_vm0, %v19_v35 }
 0x7c5   :  { %v803_v41 = vpop.permute.xlu0 %802 }
 0x895   :  { %v873_v42 = vpop.f32.mrb[8].mxu0 }
 0x896   :  { %v874_v43 = vadd.f32 %v873_v42, %v803_v41  ;;  %v1012_v44 = vpop.f32.mrb[9].mxu0 }
 0x898   :  { %878 = vst.msk [vmem:[#allocation3] sm:$0x1] %vm877_vm10, %v874_v43 }
 0x899   :  { %1113 = shalt.err (!%p1110_p4)
}
 0x89a   :  { %s1114_s1 = scalar_lea.hbm %s1273_s3, 16 }
 0x89b   :  { %p1115_p5 = scmp.ne.s32.totalorder %s1273_s3, %s1114_s1  ;;  %p1118_p6 = scmp.lt.u32.totalorder %s1114_s1, %s1273_s3 }
 0x89d   :  { %p1120_p7 = pnand %p1118_p6, %p1115_p5 }
 0x89f   :  { %1123 = shalt.err (!%p1120_p7)
}
 0x8a0   :  { %888 = dma.vmem_to_hbm [thread:$0]  %s886_s18, 16, %s1273_s3, [#allocation4]  }
 0x8a1   :  { %1124 = dma.done.wait [#allocation4], 16  }
 0x8a2   :  { %1125 = vsyncadd [#allocation4], 4294967280 }
 0x8a3   :  { %896 = vsyncpa [#allocation4], 1 }

</bundles_post_ra>
